<compile_context>
chip_gen: v5e
topology: v5e:2x2
jax: 0.10.0
libtpu: 0.0.40
codegen_flags: <defaults>
</compile_context>

<pallas_src>
import jax
import jax.numpy as jnp
from jax.experimental import pallas as pl
from jax.experimental.pallas import tpu as pltpu

LN_EPS = 1e-5  # PyTorch nn.LayerNorm default

# Tiling / VMEM policy (conservative across v5e / v6e / v7x).
_VMEM_TILE_BUDGET = 14 * 1024 * 1024   # bytes: I/O (double-buffered) + f32 temps
_MAX_ROW_TILE = 1024                   # >=512 already saturates HBM roofline
_MIN_GRID_STEPS = 8                    # feed both v7x TCs + keep pipeline full
_VMEM_LIMIT_FLOOR = 16 * 1024 * 1024
_VMEM_LIMIT_CEIL = 32 * 1024 * 1024


def _link_tower_kernel(coef_ref, h_ref, c_ref, g_ref, b_ref, o_ref):
    """One row-tile: x = a*hidden + b*cross ; out = LayerNorm(x)*gamma + beta.

    coef_ref : SMEM (2,)   -> (a, b) combine coefficients (f32)
    h_ref    : VMEM (T, H) -> hidden_states tile (native dtype)
    c_ref    : VMEM (T, H) -> cross_modal_hidden_states tile (native dtype)
    g_ref    : VMEM (1, H) -> LayerNorm weight (gamma), f32
    b_ref    : VMEM (1, H) -> LayerNorm bias (beta), f32
    o_ref    : VMEM (T, H) -> output tile
    """
    a = coef_ref[0]
    b = coef_ref[1]
    x = h_ref[...].astype(jnp.float32) * a + c_ref[...].astype(jnp.float32) * b

    # One-pass LayerNorm statistics: mean and E[x^2] from a single sweep over
    # x (no centered temporary).  Biased variance, eps=1e-5 (PyTorch default).
    inv_h = jnp.float32(1.0 / x.shape[-1])
    mean = jnp.sum(x, axis=-1, keepdims=True) * inv_h
    mean_sq = jnp.sum(x * x, axis=-1, keepdims=True) * inv_h
    var = jnp.maximum(mean_sq - mean * mean, 0.0)
    inv = jax.lax.rsqrt(var + LN_EPS)

    gamma = g_ref[...]   # already f32 (pre-cast in wrapper)
    beta = b_ref[...]
    y = (x - mean) * inv * gamma + beta
    o_ref[...] = y.astype(o_ref.dtype)


def _round_up(x, m):
    return ((x + m - 1) // m) * m


def _choose_row_tile(rows, hidden, dtype):
    """Largest row tile that (a) keeps double-buffered I/O tiles plus the
    single-buffered f32 intermediates within the VMEM budget and (b) leaves
    the grid with at least ~_MIN_GRID_STEPS steps when possible."""
    itemsize = jnp.dtype(dtype).itemsize
    sublane = {4: 8, 2: 16, 1: 32}.get(itemsize, 8)

    # 2 pipeline buffers x (hidden tile + cross tile + output tile), native dtype.
    io_bytes_per_row = 2 * 3 * hidden * itemsize
    # f32 intermediates (upcast x, products, y) materialized in internal scratch.
    tmp_bytes_per_row = 3 * hidden * 4
    per_row_bytes = io_bytes_per_row + tmp_bytes_per_row

    tile = max(sublane, _VMEM_TILE_BUDGET // max(per_row_bytes, 1))
    tile = min(tile, _MAX_ROW_TILE)

    # Keep >= ~_MIN_GRID_STEPS grid steps (v7x has 2 TCs sharing the parallel
    # axis; a 1-2 step grid also defeats double-buffering on v5e/v6e).
    min_steps_tile = _round_up(pl.cdiv(rows, _MIN_GRID_STEPS), sublane)
    tile = min(tile, max(min_steps_tile, sublane))

    tile = min(tile, _round_up(rows, sublane))
    tile = max(sublane, (tile // sublane) * sublane)
    return int(tile)


def _vmem_limit_bytes():
    """Generation-aware scoped VMEM request: ~capacity/4, clamped to 16-32 MiB
    (-> 16 MiB on v7x's 64 MiB/TC, 32 MiB on v5e/v6e's 128 MiB)."""
    try:
        cap = int(pltpu.get_tpu_info().vmem_capacity_bytes)
        return int(max(_VMEM_LIMIT_FLOOR, min(_VMEM_LIMIT_CEIL, cap // 4)))
    except Exception:
        return _VMEM_LIMIT_CEIL


def link_tower(hidden_states, cross_modal_hidden_states, params,
               link_tower_type="add", row_tile=None):
    """JAX wrapper reproducing LinkTower.forward.

    hidden_states, cross_modal_hidden_states: (B, S, H)
    params: dict with 'ln_weight' (H,), 'ln_bias' (H,) and, depending on type,
            'scaled_factor' () or 'beta' ().
    """
    B, S, H = hidden_states.shape
    rows = B * S

    if link_tower_type == "add":
        coef = jnp.array([1.0, 1.0], dtype=jnp.float32)
    elif link_tower_type == "scaled_add":
        s = params["scaled_factor"].astype(jnp.float32)
        coef = jnp.stack([s, jnp.float32(1.0)])
    elif link_tower_type == "interpolate":
        bta = params["beta"].astype(jnp.float32)
        coef = jnp.stack([1.0 - bta, bta])
    else:
        raise NotImplementedError(
            f"link_tower_type {link_tower_type} is not implemented")

    if row_tile is None:
        row_tile = _choose_row_tile(rows, H, hidden_states.dtype)

    h2d = hidden_states.reshape(rows, H)
    c2d = cross_modal_hidden_states.reshape(rows, H)
    gamma = params["ln_weight"].astype(jnp.float32).reshape(1, H)
    beta = params["ln_bias"].astype(jnp.float32).reshape(1, H)

    grid = (pl.cdiv(rows, row_tile),)
    out2d = pl.pallas_call(
        _link_tower_kernel,
        out_shape=jax.ShapeDtypeStruct((rows, H), hidden_states.dtype),
        grid=grid,
        in_specs=[
            pl.BlockSpec(memory_space=pltpu.SMEM),              # coef (2,)
            pl.BlockSpec((row_tile, H), lambda i: (i, 0)),      # hidden tile
            pl.BlockSpec((row_tile, H), lambda i: (i, 0)),      # cross tile
            pl.BlockSpec((1, H), lambda i: (0, 0)),             # gamma (const)
            pl.BlockSpec((1, H), lambda i: (0, 0)),             # beta (const)
        ],
        out_specs=pl.BlockSpec((row_tile, H), lambda i: (i, 0)),
        compiler_params=pltpu.CompilerParams(
            dimension_semantics=("parallel",),
            vmem_limit_bytes=_vmem_limit_bytes()),
    )(coef, h2d, c2d, gamma, beta)

    return out2d.reshape(B, S, H)


def _reference(hidden_states, cross, params, link_tower_type):
    h = hidden_states.astype(jnp.float32)
    c = cross.astype(jnp.float32)
    if link_tower_type == "add":
        x = h + c
    elif link_tower_type == "scaled_add":
        x = h * params["scaled_factor"].astype(jnp.float32) + c
    else:  # interpolate
        b = params["beta"].astype(jnp.float32)
        x = h * (1.0 - b) + c * b
    mean = jnp.mean(x, axis=-1, keepdims=True)
    var = jnp.mean((x - mean) ** 2, axis=-1, keepdims=True)
    y = (x - mean) * jax.lax.rsqrt(var + LN_EPS)
    y = y * params["ln_weight"].astype(jnp.float32) + params["ln_bias"].astype(jnp.float32)
    return y.astype(hidden_states.dtype)


if __name__ == "__main__":
    key = jax.random.PRNGKey(0)
    H = 256  # hidden_size = 256 (module default)

    params = {
        "ln_weight": jnp.ones((H,), dtype=jnp.float32),
        "ln_bias": jnp.zeros((H,), dtype=jnp.float32),
        "scaled_factor": jnp.float32(1.0),
        "beta": jnp.float32(0.5),
    }

    ok = True
    # (B, S) combos: divisible rows, and a non-divisible rows case to exercise
    # the cdiv/partial-block path.
    for (B, S) in ((2, 8), (2, 13)):
        k1, k2 = jax.random.split(jax.random.fold_in(key, B * 100 + S))
        hidden_states = jax.random.normal(k1, (B, S, H), dtype=jnp.float32)
        cross_modal = jax.random.normal(k2, (B, S, H), dtype=jnp.float32)
        for mode in ("add", "scaled_add", "interpolate"):
            out = link_tower(hidden_states, cross_modal, params,
                             link_tower_type=mode)
            out = jax.block_until_ready(out)
            ref = _reference(hidden_states, cross_modal, params, mode)
            if not jnp.allclose(out, ref, atol=1e-5, rtol=1e-5):
                ok = False
                print(f"MISMATCH f32 mode={mode} B={B} S={S}: "
                      f"max abs err = {jnp.max(jnp.abs(out - ref))}")

    # bf16 ingest path (sublane tile = 16, native-dtype DMA, f32 math inside).
    k1, k2 = jax.random.split(jax.random.fold_in(key, 777))
    h_bf16 = jax.random.normal(k1, (2, 8, H), dtype=jnp.float32).astype(jnp.bfloat16)
    c_bf16 = jax.random.normal(k2, (2, 8, H), dtype=jnp.float32).astype(jnp.bfloat16)
    out = jax.block_until_ready(
        link_tower(h_bf16, c_bf16, params, link_tower_type="interpolate"))
    ref = _reference(h_bf16, c_bf16, params, "interpolate")
    if not jnp.allclose(out.astype(jnp.float32), ref.astype(jnp.float32),
                        atol=3e-2, rtol=3e-2):
        ok = False
        print("MISMATCH bf16 interpolate: "
              f"max abs err = {jnp.max(jnp.abs(out.astype(jnp.float32) - ref.astype(jnp.float32)))}")

    if ok:
        print("KERNEL_OK")
</pallas_src>

<mosaic_0001>
module attributes {stable_mosaic.version = 11 : i64} {
  func.func @_link_tower_kernel(%arg0: i32, %arg1: memref<2xf32, #tpu.memory_space<smem>>, %arg2: memref<8x256xf32, #tpu.memory_space<vmem>>, %arg3: memref<8x256xf32, #tpu.memory_space<vmem>>, %arg4: memref<1x256xf32, #tpu.memory_space<vmem>>, %arg5: memref<1x256xf32, #tpu.memory_space<vmem>>, %arg6: memref<8x256xf32, #tpu.memory_space<vmem>>) attributes {dimension_semantics = [#tpu.dimension_semantics<parallel>], iteration_bounds = array<i64: 2>, scalar_prefetch = 0 : i64, scratch_operands = 0 : i64, tpu.core_type = #tpu.core_type<tc>, window_params = [{transform_indices = @transform_0, window_bounds = array<i64: 2>}, {transform_indices = @transform_1, window_bounds = array<i64: 8, 256>}, {transform_indices = @transform_2, window_bounds = array<i64: 8, 256>}, {pipeline_mode = #tpu.pipeline_mode<synchronous>, transform_indices = @transform_3, window_bounds = array<i64: 1, 256>}, {pipeline_mode = #tpu.pipeline_mode<synchronous>, transform_indices = @transform_4, window_bounds = array<i64: 1, 256>}, {transform_indices = @transform_5, window_bounds = array<i64: 8, 256>}]} {
    %c0 = arith.constant 0 : index
    %0 = memref.load %arg1[%c0] : memref<2xf32, #tpu.memory_space<smem>>
    %c1 = arith.constant 1 : index
    %1 = memref.load %arg1[%c1] : memref<2xf32, #tpu.memory_space<smem>>
    %c0_0 = arith.constant 0 : index
    %c0_1 = arith.constant 0 : index
    %2 = vector.load %arg2[%c0_0, %c0_1] : memref<8x256xf32, #tpu.memory_space<vmem>>, vector<8x256xf32>
    %3 = vector.broadcast %0 : f32 to vector<8x256xf32>
    %4 = arith.mulf %2, %3 : vector<8x256xf32>
    %c0_2 = arith.constant 0 : index
    %c0_3 = arith.constant 0 : index
    %5 = vector.load %arg3[%c0_2, %c0_3] : memref<8x256xf32, #tpu.memory_space<vmem>>, vector<8x256xf32>
    %6 = vector.broadcast %1 : f32 to vector<8x256xf32>
    %7 = arith.mulf %5, %6 : vector<8x256xf32>
    %8 = arith.addf %4, %7 : vector<8x256xf32>
    %cst = arith.constant dense<0.000000e+00> : vector<8xf32>
    %9 = vector.multi_reduction <add>, %8, %cst [1] : vector<8x256xf32> to vector<8xf32>
    %10 = vector.shape_cast %9 : vector<8xf32> to vector<8x1xf32>
    %cst_4 = arith.constant 3.906250e-03 : f32
    %11 = vector.broadcast %cst_4 : f32 to vector<8x1xf32>
    %12 = arith.mulf %10, %11 : vector<8x1xf32>
    %13 = arith.mulf %8, %8 : vector<8x256xf32>
    %cst_5 = arith.constant dense<0.000000e+00> : vector<8xf32>
    %14 = vector.multi_reduction <add>, %13, %cst_5 [1] : vector<8x256xf32> to vector<8xf32>
    %15 = vector.shape_cast %14 : vector<8xf32> to vector<8x1xf32>
    %cst_6 = arith.constant 3.906250e-03 : f32
    %16 = vector.broadcast %cst_6 : f32 to vector<8x1xf32>
    %17 = arith.mulf %15, %16 : vector<8x1xf32>
    %18 = arith.mulf %12, %12 : vector<8x1xf32>
    %19 = arith.subf %17, %18 : vector<8x1xf32>
    %cst_7 = arith.constant 0.000000e+00 : f32
    %20 = vector.broadcast %cst_7 : f32 to vector<8x1xf32>
    %21 = arith.maximumf %19, %20 : vector<8x1xf32>
    %cst_8 = arith.constant 9.99999974E-6 : f32
    %22 = vector.broadcast %cst_8 : f32 to vector<8x1xf32>
    %23 = arith.addf %21, %22 : vector<8x1xf32>
    %24 = math.rsqrt %23 : vector<8x1xf32>
    %c0_9 = arith.constant 0 : index
    %c0_10 = arith.constant 0 : index
    %25 = vector.load %arg4[%c0_9, %c0_10] : memref<1x256xf32, #tpu.memory_space<vmem>>, vector<1x256xf32>
    %c0_11 = arith.constant 0 : index
    %c0_12 = arith.constant 0 : index
    %26 = vector.load %arg5[%c0_11, %c0_12] : memref<1x256xf32, #tpu.memory_space<vmem>>, vector<1x256xf32>
    %27 = vector.broadcast %12 : vector<8x1xf32> to vector<8x256xf32>
    %28 = arith.subf %8, %27 : vector<8x256xf32>
    %29 = vector.broadcast %24 : vector<8x1xf32> to vector<8x256xf32>
    %30 = arith.mulf %28, %29 : vector<8x256xf32>
    %31 = vector.broadcast %25 : vector<1x256xf32> to vector<8x256xf32>
    %32 = arith.mulf %30, %31 : vector<8x256xf32>
    %33 = vector.broadcast %26 : vector<1x256xf32> to vector<8x256xf32>
    %34 = arith.addf %32, %33 : vector<8x256xf32>
    %c0_13 = arith.constant 0 : index
    %c0_14 = arith.constant 0 : index
    %35 = vector.load %arg6[%c0_13, %c0_14] : memref<8x256xf32, #tpu.memory_space<vmem>>, vector<8x256xf32>
    tpu.vector_store %arg6[%c0_13, %c0_14], %34 {strides = array<i32>} : memref<8x256xf32, #tpu.memory_space<vmem>>, vector<8x256xf32>,
    return
  }
  func.func @transform_0(%arg0: i32) -> i32 {
    %c0_i32 = arith.constant 0 : i32
    %c0_i32_0 = arith.constant 0 : i32
    return %c0_i32 : i32
  }
  func.func @transform_1(%arg0: i32) -> (i32, i32) {
    %c0_i32 = arith.constant 0 : i32
    %c0_i32_0 = arith.constant 0 : i32
    return %arg0, %c0_i32 : i32, i32
  }
  func.func @transform_2(%arg0: i32) -> (i32, i32) {
    %c0_i32 = arith.constant 0 : i32
    %c0_i32_0 = arith.constant 0 : i32
    return %arg0, %c0_i32 : i32, i32
  }
  func.func @transform_3(%arg0: i32) -> (i32, i32) {
    %c0_i32 = arith.constant 0 : i32
    %c0_i32_0 = arith.constant 0 : i32
    %c0_i32_1 = arith.constant 0 : i32
    return %c0_i32, %c0_i32_0 : i32, i32
  }
  func.func @transform_4(%arg0: i32) -> (i32, i32) {
    %c0_i32 = arith.constant 0 : i32
    %c0_i32_0 = arith.constant 0 : i32
    %c0_i32_1 = arith.constant 0 : i32
    return %c0_i32, %c0_i32_0 : i32, i32
  }
  func.func @transform_5(%arg0: i32) -> (i32, i32) {
    %c0_i32 = arith.constant 0 : i32
    %c0_i32_0 = arith.constant 0 : i32
    return %arg0, %c0_i32 : i32, i32
  }
}

</mosaic_0001>

<bundles_post_ra>
// kernel: tpu_custom_call.1
= control target key start
LH: loop header
LB: loop body
LE: loop exit
PB: predicated region body
PF: predicated region fallthrough
CT: control target
= control target key end

     0   :  { %s999_s0 = inlined_call_operand.hbm [shape: f32[2], index: 0, kind: input, shape index: {}]   ;;  %s1000_s1 = inlined_call_operand.hbm [shape: f32[16,256], index: 1, kind: input, shape index: {}]   ;;  %s1001_s2 = inlined_call_operand.hbm [shape: f32[16,256], index: 2, kind: input, shape index: {}]   ;;  %s1002_s3 = inlined_call_operand.vmem [shape: f32[1,256], index: 3, kind: input, shape index: {}]   ;;  %s1003_s4 = inlined_call_operand.hbm [shape: f32[1,256], index: 4, kind: input, shape index: {}]   ;;  %s1004_s5 = inlined_call_operand.hbm [shape: f32[16,256], index: 5, kind: output, shape index: {}]  }
   0x1   :  { %1006 = sst [smem:[#allocation18_spill]] %s999_s0 }
   0x2   :  { %1007 = sst [smem:[#allocation19_spill]] %s1003_s4 }
   0x3   :  { %10 = vsyncpa [#allocation5], 0 }
   0x4   :  { %11 = vsyncpa [#allocation3], 0 }
   0x5   :  { %13 = vsyncpa [#allocation3 + $0x1], 0 }
   0x6   :  { %14 = vsyncpa [#allocation8], 0 }
   0x7   :  { %16 = vsyncpa [#allocation8 + $0x1], 0 }
   0x8   :  { %17 = vsyncpa [#allocation4], 0 }
   0x9   :  { %19 = vsyncpa [#allocation4 + $0x1], 0  ;;  %s819_s18 = smov 0   ;;  %s821_s19 = smov 0  }
   0xa   :  { %s823_s20 = smov 0   ;;  %s825_s21 = smov 0  }
   0xb LB: > { %1008 = sst [smem:[#allocation16_spill]] %s781_s20  ;;  %s840_s22 = sadd.s32 4294967295, %s785_s21   ;;  %s785_s21 = sphi %s825_s21, %s1022_s21   ;;  %s781_s20 = sphi %s823_s20, %s1019_s20   ;;  %s777_s19 = sphi %s821_s19, %s1021_s19   ;;  %s773_s18 = sphi %s819_s18, %s1020_s18  }
   0xc   : > { %s502_s23 = sadd.s32 4294967294, %s785_s21   ;;  %p66_p0 = scmp.ne.s32.totalorder %s777_s19, %s773_s18 }
   0xd   : > { %p67_p1 = scmp.eq.s32.totalorder %s840_s22, 0  ;;  %p158_p2 = scmp.eq.s32.totalorder %s840_s22, 1 }
   0xe   : > { %p164_p3 = scmp.eq.s32.totalorder %s502_s23, 1  ;;  %p503_p5 = scmp.ge.s32.totalorder %s785_s21, 1 }
   0xf   : > { %p849_p4 = por %p67_p1, %p66_p0  ;;  %p171_p7 = scmp.lt.s32.totalorder %s785_s21, 3 }
  0x10   : > { %p854_p6 = por %p164_p3, %p66_p0  ;;  %s1011_s4 = sld [smem:[#allocation19_spill]] }
  0x11   : > { %p862_p8 = pnand %p503_p5, %p171_p7  ;;  %s787_s30 = smov [#allocation9]  }
  0x12   : > { %s198_s6 = sshll.u32 %s787_s30, 4  ;;  %s1013_s0 = sld [smem:[#allocation18_spill]]  ;;  %s199_s6 = int_to_ptr.vmem [resolvable:$true] %s198_s6 }
  0x13   : > { %p542_p10 = pneg %p862_p8  ;;  %s788_s10 = smov [#allocation2]  }
  0x14   : > { %s875_s11 = sadd.s32 1, %s785_s21   ;;  %s53_s12 = sadd.s32 1, %s781_s20 }
  0x15   : > { %p543_p11 = pnand %p542_p10, %p67_p1  ;;  %s50_s13 = ssub.s32 %s785_s21, %s875_s11 }
  0x16   : > { %s196_s28 = sshll.u32 %s1011_s4, 4  ;;  %p60_p12 = scmp.ne.s32.totalorder %s781_s20, %s777_s19  ;;  %s197_s28 = int_to_ptr.hbm [resolvable:$true] %s196_s28 }
  0x17   : > { %548 = dma.hbm_to_vmem [thread:$0]  (!%p543_p11), %s197_s28, 32, %s199_s6, [#allocation8]  }
  0x18   : > { %s183_s9 = sshll.u32 %s1013_s0, 4  ;;  %p51_p13 = scmp.eq.s32.totalorder %s50_s13, 0  ;;  %s184_s9 = int_to_ptr.hbm [resolvable:$true] %s183_s9 }
  0x19   : > { %545 = dma.hbm_to_smem (!%p543_p11), %s184_s9, 16, %s788_s10, [#allocation5]  }
  0x1a   : > { %p61_p0 = scmp.eq.s32.totalorder %s785_s21, 0  ;;  %p885_p3 = por %p158_p2, %p60_p12 }
  0x1b   : > { %p562_p5 = scmp.lt.s32.totalorder %s785_s21, 2  ;;  %s209_s16 = sand.u32 1, %s781_s20  }
  0x1c   : > { %s891_s15 = scalar_select %p51_p13, %s781_s20, %s53_s12  }
  0x1d   : > { %p62_p7 = por %p61_p0, %p60_p12  ;;  %s894_s17 = sshll.u32 %s209_s16, 4 }
  0x1e   : > { %1015 = sst [smem:[#allocation17_spill]] %s891_s15  ;;  %s525_s23 = sshll.u32 %s785_s21, 4 }
  0x1f   : > { %s218_s28 = scalar_lea.hbm %s1000_s1, %s525_s23  ;;  %s213_s30 = scalar_lea.vmem [#allocation6], %s894_s17 }
  0x20   : > { %s222_s6 = sshll.u32 %s213_s30, 4  ;;  %s220_s7 = sshll.u32 %s218_s28, 4  ;;  %s223_s6 = int_to_ptr.vmem [resolvable:$true] %s222_s6  ;;  %s221_s7 = int_to_ptr.hbm [resolvable:$true] %s220_s7 }
  0x21   : > { %p901_p2 = pnand %p562_p5, %p62_p7  ;;  %s238_s12 = scalar_lea.hbm %s1001_s2, %s525_s23 }
  0x22   : > { %s229_s13 = sand.u32 1, %s785_s21   ;;  %s210_s0 = scalar_lea.sflag [#allocation3], %s209_s16 }
  0x23   : > { %s647_s4 = sshra.s32 %s221_s7, 4  ;;  %p651_p11 = pneg %p901_p2  ;;  %s648_s4 = int_to_ptr.hbm [resolvable:$true] %s647_s4 }
  0x24   : > { %s649_s26 = scalar_lea.hbm %s648_s4, 16  ;;  %s654_s30 = scalar_lea.hbm %s1000_s1, 32 }
  0x25   : > { %p650_p10 = scmp.ne.s32.totalorder %s648_s4, %s649_s26  ;;  %p655_p0 = scmp.lt.s32.totalorder %s648_s4, %s1000_s1 }
  0x26   : > { %p656_p5 = scmp.lt.s32.totalorder %s654_s30, %s649_s26 }
  0x27   : > { %p652_p12 = pnand %p651_p11, %p650_p10 }
  0x28   : > { %p657_p7 = por %p656_p5, %p655_p0 }
  0x29   : > { %p653_p13 = pneg %p652_p12 }
  0x2b   : > { %p658_p9 = pnand %p657_p7, %p653_p13 }
  0x2d   : > { %661 = shalt.err (!%p658_p9)
}
  0x2e   : > { %552 = dma.hbm_to_vmem [thread:$0]  (!%p901_p2), %s221_s7, 256, %s223_s6, %s210_s0  }
  0x2f   : > { %s240_s16 = sshll.u32 %s238_s12, 4  ;;  %s233_s23 = scalar_lea.vmem [#allocation7], %s894_s17  ;;  %s241_s16 = int_to_ptr.hbm [resolvable:$true] %s240_s16 }
  0x30   : > { %s242_s15 = sshll.u32 %s233_s23, 4  ;;  %s230_s27 = scalar_lea.sflag [#allocation8], %s229_s13  ;;  %s243_s15 = int_to_ptr.vmem [resolvable:$true] %s242_s15 }
  0x31   : > { %s677_s28 = sshra.s32 %s241_s16, 4  ;;  %s684_s30 = scalar_lea.hbm %s1001_s2, 32  ;;  %s678_s28 = int_to_ptr.hbm [resolvable:$true] %s677_s28 }
  0x32   : > { %s679_s20 = scalar_lea.hbm %s678_s28, 16  ;;  %p685_p9 = scmp.lt.s32.totalorder %s678_s28, %s1001_s2 }
  0x33   : > { %p680_p10 = scmp.ne.s32.totalorder %s678_s28, %s679_s20  ;;  %p686_p0 = scmp.lt.s32.totalorder %s684_s30, %s679_s20 }
  0x35   : > { %p682_p12 = pnand %p680_p10, %p651_p11  ;;  %p687_p5 = por %p686_p0, %p685_p9 }
  0x37   : > { %p683_p13 = pneg %p682_p12 }
  0x39   : > { %p688_p7 = pnand %p687_p5, %p683_p13 }
  0x3b   : > { %691 = shalt.err (!%p688_p7)
}
  0x3c   : > { %555 = dma.hbm_to_vmem [thread:$0]  (!%p901_p2), %s241_s16, 256, %s243_s15, %s230_s27  }
  0x3d   : > { %251 = sbr.rel (%p862_p8) target bundleno = 252 (0xfc), region = 40 }
  0x42   : > { %752 = dma.done.wait (%p67_p1), [#allocation5], 16  }
  0x43   : > { %754 = vsyncadd (%p67_p1), [#allocation5], 4294967280  ;;  %s941_s17 = sand.u32 1, %s777_s19  }
  0x44   : > { %s944_s20 = sshll.u32 %s941_s17, 4  ;;  %s259_s6 = scalar_lea.sflag [#allocation3], %s941_s17 }
  0x45   : > { %s262_s15 = scalar_lea.vmem [#allocation6], %s944_s20 }
  0x46   : > { %756 = dma.done.wait (%p849_p4), %s259_s6, 256  }
  0x47   : > { %758 = vsyncadd (%p849_p4), %s259_s6, 4294967040  ;;  %s268_s29 = sand.u32 1, %s840_s22   ;;  %s272_s8 = scalar_lea.vmem [#allocation7], %s944_s20 }
  0x48   : > { %s269_s7 = scalar_lea.sflag [#allocation8], %s268_s29 }
  0x49   : > { %760 = dma.done.wait (%p849_p4), %s269_s7, 256  }
  0x4a   : > { %762 = vsyncadd (%p849_p4), %s269_s7, 4294967040 }
  0x4b   : > { %764 = dma.done.wait (%p67_p1), [#allocation8], 32  }
  0x4c   : > { %766 = vsyncadd (%p67_p1), [#allocation8], 4294967264 }
  0x4d   : > { %283 = sfence }
  0x4e   : > { %s311_s12 = sld [smem:[#allocation2]]  ;;  %v313_v0 = vld [vmem:[%s262_s15] sm:$0xff]  ;;  %v314_v1 = vld [vmem:[%s262_s15 + $0x8] sm:$0xff]  ;;  %s527_s16 = sshll.u32 %s840_s22, 4 }
  0x4f   : > { %s519_s13 = sld [smem:[#allocation2 + $0x1]]  ;;  %v318_v2 = vld [vmem:[%s272_s8] sm:$0xff]  ;;  %v319_v3 = vld [vmem:[%s272_s8 + $0x8] sm:$0xff]  ;;  %s383_s28 = scalar_lea.hbm %s1004_s5, %s527_s16 }
  0x50   : > { %v349_v29 = vld [vmem:[%s1002_s3] sm:$0x3]  ;;  %v350_v31 = vld [vmem:[#allocation9] sm:$0x3]  ;;  %s310_s22 = scalar_lea.vmem [#allocation10], %s944_s20  ;;  %s387_s26 = sshll.u32 %s383_s28, 4  ;;  %s388_s26 = int_to_ptr.hbm [resolvable:$true] %s387_s26 }
  0x51   : > { %v356_v34 = vperm.slane %v349_v29, 0  ;;  %v357_v35 = vperm.slane %v349_v29, 1  ;;  %v363_v39 = vperm.slane %v350_v31, 0  ;;  %v364_v40 = vperm.slane %v350_v31, 1  ;;  %s385_s4 = sshll.u32 %s310_s22, 4  ;;  %s372_s30 = scalar_lea.sflag [#allocation4], %s941_s17  ;;  %s386_s4 = int_to_ptr.vmem [resolvable:$true] %s385_s4 }
  0x52   : > { %s721_s9 = sshra.s32 %s388_s26, 4  ;;  %s727_s20 = scalar_lea.hbm %s1004_s5, 32  ;;  %s722_s9 = int_to_ptr.hbm [resolvable:$true] %s721_s9 }
  0x53   : > { %s723_s0 = scalar_lea.hbm %s722_s9, 16  ;;  %p728_p2 = scmp.lt.s32.totalorder %s722_s9, %s1004_s5 }
  0x54   : > { %v315_v4 = vstv %s311_s12  ;;  %p724_p1 = scmp.ne.s32.totalorder %s722_s9, %s723_s0  ;;  %p729_p11 = scmp.lt.s32.totalorder %s727_s20, %s723_s0 }
  0x55   : > { %v316_v5 = vmul.f32 %v315_v4, %v313_v0  ;;  %v317_v6 = vmul.f32 %v315_v4, %v314_v1  ;;  %v320_v7 = vstv %s519_s13 }
  0x56   : > { %v321_v8 = vmul.f32 %v320_v7, %v318_v2  ;;  %v322_v9 = vmul.f32 %v320_v7, %v319_v3  ;;  %p725_p4 = pnand %p724_p1, %p885_p3  ;;  %p730_p10 = por %p729_p11, %p728_p2 }
  0x58   : > { %v323_v10 = vadd.f32 %v321_v8, %v316_v5  ;;  %v324_v11 = vadd.f32 %v322_v9, %v317_v6  ;;  %p726_p8 = pneg %p725_p4 }
  0x5a   : > { %v325_v12 = vadd.f32 %v324_v11, %v323_v10  ;;  %v329_v13 = vmul.f32 %v323_v10, %v323_v10  ;;  %v330_v14 = vmul.f32 %v324_v11, %v324_v11  ;;  %p731_p12 = pnand %p730_p10, %p726_p8 }
  0x5c   : > { %326 = vadd.xlane.f32.xlu0 %v325_v12  ;;  %v331_v15 = vadd.f32 %v330_v14, %v329_v13 }
  0x64   : > { %332 = vadd.xlane.f32.xlu0 %v331_v15 }
  0xcf   : > { %v327_v16 = vpop.xlane.xlu0 %326 }
  0xd0   : > { %v328_v17 = vmul.f32 0.00390625, %v327_v16 }
  0xd2   : > { %v335_v19 = vmul.f32 %v328_v17, %v328_v17  ;;  %v351_v32 = vsub.f32 %v323_v10, %v328_v17  ;;  %v352_v33 = vsub.f32 %v324_v11, %v328_v17 }
  0xd7   : > { %v333_v18 = vpop.xlane.xlu0 %332 }
  0xd8   : > { %v334_v20 = vmul.f32 0.00390625, %v333_v18 }
  0xda   : > { %v336_v21 = vsub.f32 %v334_v20, %v335_v19 }
  0xdc   : > { %v337_v22 = vmax.f32 %v336_v21, 0.0 }
  0xde   : > { %v338_v23 = vadd.f32 1e-05, %v337_v22 }
  0xe0   : > { %600 = vrsqrt.f32 %v338_v23  ;;  %vm345_vm1 = vweird.f32 %v338_v23 }
  0xe6   : > { %v601_v24 = vpop.eup %600 }
  0xe7   : > { %v340_v25 = vmul.f32 %v601_v24, %v338_v23  ;;  %vm346_vm0 = vweird.f32 %v601_v24 }
  0xe8   : > { %vm347_vm2 = vmor %vm345_vm1, %vm346_vm0 }
  0xe9   : > { %v341_v26 = vmul.f32 %v601_v24, %v340_v25 }
  0xeb   : > { %v342_v27 = vmul.f32 0.5, %v341_v26 }
  0xed   : > { %v343_v28 = vsub.f32 1.5, %v342_v27 }
  0xef   : > { %v344_v30 = vmul.f32 %v601_v24, %v343_v28 }
  0xf1   : > { %v348_v36 = vsel %vm347_vm2, %v601_v24, %v344_v30 }
  0xf2   : > { %v353_v37 = vmul.f32 %v351_v32, %v348_v36  ;;  %v354_v38 = vmul.f32 %v352_v33, %v348_v36 }
  0xf4   : > { %v360_v41 = vmul.f32 %v356_v34, %v353_v37  ;;  %v361_v42 = vmul.f32 %v357_v35, %v354_v38 }
  0xf6   : > { %v367_v43 = vadd.f32 %v363_v39, %v360_v41  ;;  %v368_v44 = vadd.f32 %v364_v40, %v361_v42 }
  0xf8   : > { %369 = vst [vmem:[%s310_s22] sm:$0xff] %v367_v43 }
  0xf9   : > { %370 = vst [vmem:[%s310_s22 + $0x8] sm:$0xff] %v368_v44 }
  0xfa   : > { %734 = shalt.err (!%p731_p12)
}
  0xfb   : > { %540 = dma.vmem_to_hbm [thread:$0]  (%p885_p3), %s386_s4, 256, %s388_s26, %s372_s30  }
  0xfc PF: > { %s399_s17 = sand.u32 1, %s773_s18   ;;  %p1017_p13 = scmp.ge.s32.totalorder %s785_s21, 2 }
  0xfd   : > { %s400_s8 = scalar_lea.sflag [#allocation4], %s399_s17 }
  0xfe   : > { %p557_p9 = pnand %p1017_p13, %p854_p6 }
 0x100   : > { %p558_p0 = pneg %p557_p9 }
 0x102   : > { %768 = dma.done.wait (%p558_p0), %s400_s8, 256  }
 0x103   : > { %770 = vsyncadd (%p558_p0), %s400_s8, 4294967040  ;;  %s1018_s12 = sld [smem:[#allocation16_spill]]  ;;  %p22_p5 = scmp.ge.s32.totalorder %s875_s11, 4  }
 0x104   : > { %s1019_s20 = sld [smem:[#allocation17_spill]]  ;;  %s1020_s18 = smov %s777_s19 }
 0x105   : > { %s1022_s21 = smov %s875_s11  ;;  %24 = sbr.rel (!%p22_p5) target bundleno = 11 (0xb), region = 107 }
 0x109   : > { %s1021_s19 = smov %s1018_s12 }
 0x10a   :  { %406 = vsyncpa [#allocation3], 1 }
 0x10b   :  { %408 = vsyncpa [#allocation3 + $0x1], 1 }
 0x10c   :  { %409 = vsyncpa [#allocation8], 1 }
 0x10d   :  { %411 = vsyncpa [#allocation8 + $0x1], 1 }
 0x10e   :  { %412 = vsyncpa [#allocation4], 1 }
 0x10f   :  { %414 = vsyncpa [#allocation4 + $0x1], 1 }
 0x110   :  { %415 = vsyncpa [#allocation5], 1 }
 0x111   :  { %417 = vsyncpa [#allocation5 + $0x1], 1 }

</bundles_post_ra>
